<compile_context>
chip_gen: v7x
topology: tpu7x:2x2x1
jax: 0.10.0
libtpu: 0.0.40
codegen_flags: <defaults>
</compile_context>

<pallas_src>
import functools

import jax
import jax.numpy as jnp
from jax.experimental import pallas as pl
from jax.experimental.pallas import tpu as pltpu

EPS = 1e-5
NEG_SLOPE = 0.01
LANES = 128                      # every hidden dim (64/32/16/1) fits in one lane tile
COMPUTE_DTYPE = jnp.bfloat16     # matmul operand dtype; accumulation stays f32
VMEM_LIMIT_BYTES = 40 * 1024 * 1024


def _round_up(n, m):
    return ((n + m - 1) // m) * m


def _cdiv(a, b):
    return (a + b - 1) // b


def _leaky_relu(x):
    return jnp.where(x > 0, x, NEG_SLOPE * x)


def _bn_eval(x, gamma, beta, mean, var):
    return gamma * (x - mean) * jax.lax.rsqrt(var + EPS) + beta


# ---------------------------------------------------------------------------
# Kernel
# ---------------------------------------------------------------------------
def mlp_kernel(x_ref, w_ref, b_ref, o_ref, *, d_pad):
    # x_ref : [TB, d_pad]           bf16, one batch tile
    # w_ref : [d_pad + 3*128, 128]  bf16, packed BN-folded weights (zero padded)
    # b_ref : [8, 128]              f32, rows 0..3 = folded biases b1..b4 (zero padded)
    # o_ref : [TB, 1]               f32
    x = x_ref[...]

    w1 = w_ref[pl.ds(0, d_pad), :]                  # [d_pad, 128] (cols >= 64 zero)
    w2 = w_ref[pl.ds(d_pad, LANES), :]              # [128, 128]   (rows>=64 / cols>=32 zero)
    w3 = w_ref[pl.ds(d_pad + LANES, LANES), :]      # [128, 128]   (rows>=32 / cols>=16 zero)
    w4 = w_ref[pl.ds(d_pad + 2 * LANES, LANES), :]  # [128, 128]   (rows>=16 / cols>=1  zero)

    b1 = b_ref[pl.ds(0, 1), :]
    b2 = b_ref[pl.ds(1, 1), :]
    b3 = b_ref[pl.ds(2, 1), :]
    b4 = b_ref[pl.ds(3, 1), :]

    # Layer 1: (fc1 + folded bn1) -> leaky_relu   (dropout = identity in eval mode)
    h = jnp.dot(x, w1, preferred_element_type=jnp.float32) + b1
    h = _leaky_relu(h)
    # Layer 2
    h = jnp.dot(h.astype(COMPUTE_DTYPE), w2, preferred_element_type=jnp.float32) + b2
    h = _leaky_relu(h)
    # Layer 3
    h = jnp.dot(h.astype(COMPUTE_DTYPE), w3, preferred_element_type=jnp.float32) + b3
    h = _leaky_relu(h)
    # Output head (fc4); only lane 0 is meaningful.
    out = jnp.dot(h.astype(COMPUTE_DTYPE), w4, preferred_element_type=jnp.float32) + b4
    o_ref[...] = out[:, 0:1]


# ---------------------------------------------------------------------------
# Host-side parameter folding + packing (call ONCE; not in the per-call path)
# ---------------------------------------------------------------------------
def fold_and_pack(params, input_dim):
    """Fold eval-mode BN into the linears, pack into (bf16 weight slab, f32 bias slab)."""
    d_pad = _round_up(input_dim, 16)          # bf16 sublane-tile aligned row offsets
    r_total = d_pad + 3 * LANES
    w_slab = jnp.zeros((r_total, LANES), jnp.float32)
    b_slab = jnp.zeros((8, LANES), jnp.float32)

    row_off = [0, d_pad, d_pad + LANES, d_pad + 2 * LANES]
    for li in range(1, 5):
        w = params[f"w{li}"].astype(jnp.float32)   # [din, dout]
        b = params[f"b{li}"][0].astype(jnp.float32)
        if li <= 3:
            g = params[f"g{li}"][0]
            be = params[f"be{li}"][0]
            m = params[f"m{li}"][0]
            v = params[f"v{li}"][0]
            scale = g * jax.lax.rsqrt(v + EPS)
            w = w * scale[None, :]
            b = (b - m) * scale + be
        din, dout = w.shape
        r0 = row_off[li - 1]
        w_slab = w_slab.at[r0:r0 + din, :dout].set(w)
        b_slab = b_slab.at[li - 1, :dout].set(b)
    # Weights go to bf16 (MXU-native, half the DMA); biases stay f32 (added post-accum).
    return w_slab.astype(COMPUTE_DTYPE), b_slab


# ---------------------------------------------------------------------------
# Wrapper
# ---------------------------------------------------------------------------
def _choose_tb(batch, d_pad, *, tb_cap=4096, target_block_bytes=1 << 20):
    """Batch tile: ~1 MiB of x per DMA step, multiple of 16 (bf16 sublane tile),
    and at least 2 grid steps when the batch allows (v7x dual-TC sharding)."""
    elem_bytes = jnp.dtype(COMPUTE_DTYPE).itemsize
    tb = target_block_bytes // max(1, d_pad * elem_bytes)
    tb = max(16, min(tb_cap, (tb // 16) * 16))
    tb = min(tb, max(16, _round_up(_cdiv(batch, 2), 16)))
    return tb


def mlp_forward(x, w_slab, b_slab, *, tb=None):
    """x: [B, input_dim]. Returns [B, 1] float32 (eval-mode forward).

    w_slab/b_slab come from fold_and_pack() (precompute once / outside jit)."""
    B, D = x.shape
    d_pad = _round_up(D, 16)
    assert w_slab.shape == (d_pad + 3 * LANES, LANES), "slab does not match input_dim"
    assert b_slab.shape == (8, LANES)

    if tb is None:
        tb = _choose_tb(B, d_pad)
    tb = max(16, _round_up(tb, 16))
    b_pad = _round_up(B, tb)

    if b_pad != B or d_pad != D:
        # Only taken when shapes are unaligned; aligned inputs pass straight through.
        x_c = jnp.zeros((b_pad, d_pad), COMPUTE_DTYPE).at[:B, :D].set(
            x.astype(COMPUTE_DTYPE))
    else:
        x_c = x.astype(COMPUTE_DTYPE)   # no-op if the caller already supplies bf16

    grid = (b_pad // tb,)
    kernel = functools.partial(mlp_kernel, d_pad=d_pad)

    out = pl.pallas_call(
        kernel,
        out_shape=jax.ShapeDtypeStruct((b_pad, 1), jnp.float32),
        grid=grid,
        in_specs=[
            # x: walks the batch axis (pipelined HBM->VMEM per tile)
            pl.BlockSpec((tb, d_pad), lambda i: (i, 0)),
            # packed weights / biases: constant block index -> resident across steps
            pl.BlockSpec((d_pad + 3 * LANES, LANES), lambda i: (0, 0)),
            pl.BlockSpec((8, LANES), lambda i: (0, 0)),
        ],
        out_specs=pl.BlockSpec((tb, 1), lambda i: (i, 0)),
        compiler_params=pltpu.CompilerParams(
            dimension_semantics=("parallel",),
            vmem_limit_bytes=VMEM_LIMIT_BYTES,
        ),
    )(x_c, w_slab, b_slab)
    return out[:B]


# ---------------------------------------------------------------------------
# Deterministic parameter init (shapes follow the PyTorch module) + reference
# ---------------------------------------------------------------------------
def init_params(key, input_dim):
    dims = [(input_dim, 64), (64, 32), (32, 16), (16, 1)]
    params = {}
    keys = jax.random.split(key, 32)
    ki = 0
    for li, (din, dout) in enumerate(dims, start=1):
        bound = 1.0 / jnp.sqrt(din)
        # stored as [in, out] (transpose of torch's [out, in]) so kernel does x @ W
        params[f"w{li}"] = jax.random.uniform(
            keys[ki], (din, dout), jnp.float32, -bound, bound); ki += 1
        params[f"b{li}"] = jax.random.uniform(
            keys[ki], (1, dout), jnp.float32, -bound, bound); ki += 1
        if li <= 3:  # BatchNorm1d params (gamma, beta, running mean, running var)
            params[f"g{li}"] = jax.random.uniform(
                keys[ki], (1, dout), jnp.float32, 0.5, 1.5); ki += 1
            params[f"be{li}"] = jax.random.uniform(
                keys[ki], (1, dout), jnp.float32, -0.5, 0.5); ki += 1
            params[f"m{li}"] = jax.random.uniform(
                keys[ki], (1, dout), jnp.float32, -1.0, 1.0); ki += 1
            params[f"v{li}"] = jax.random.uniform(
                keys[ki], (1, dout), jnp.float32, 0.5, 2.0); ki += 1
    return params


def mlp_reference(x, p):
    """Pure-JAX f32 reference (un-folded BN) of the eval-mode forward pass."""
    h = x @ p["w1"] + p["b1"]
    h = _leaky_relu(_bn_eval(h, p["g1"], p["be1"], p["m1"], p["v1"]))
    h = h @ p["w2"] + p["b2"]
    h = _leaky_relu(_bn_eval(h, p["g2"], p["be2"], p["m2"], p["v2"]))
    h = h @ p["w3"] + p["b3"]
    h = _leaky_relu(_bn_eval(h, p["g3"], p["be3"], p["m3"], p["v3"]))
    return h @ p["w4"] + p["b4"]


if __name__ == "__main__":
    key = jax.random.PRNGKey(0)
    k_x, k_p = jax.random.split(key)

    B, INPUT_DIM = 32, 32
    x = jax.random.normal(k_x, (B, INPUT_DIM), jnp.float32)
    params = init_params(k_p, INPUT_DIM)

    # One-time parameter folding/packing (hoisted out of the per-call path).
    w_slab, b_slab = fold_and_pack(params, INPUT_DIM)

    fwd = jax.jit(mlp_forward)
    out = jax.block_until_ready(fwd(x, w_slab, b_slab))

    ref = mlp_reference(x, params)
    assert out.shape == (B, 1)
    # bf16 operands (f32 accumulation) -> loosened tolerance vs the exact-f32 reference.
    assert jnp.allclose(out, ref, atol=5e-2, rtol=5e-2), "mismatch vs reference"

    print("KERNEL_OK")
</pallas_src>

<mosaic_0001>
module attributes {stable_mosaic.version = 11 : i64} {
  func.func @mlp_kernel(%arg0: i32, %arg1: memref<16x32xbf16, #tpu.memory_space<vmem>>, %arg2: memref<416x128xbf16, #tpu.memory_space<vmem>>, %arg3: memref<8x128xf32, #tpu.memory_space<vmem>>, %arg4: memref<16x1xf32, #tpu.memory_space<vmem>>) attributes {dimension_semantics = [#tpu.dimension_semantics<parallel>], iteration_bounds = array<i64: 2>, scalar_prefetch = 0 : i64, scratch_operands = 0 : i64, tpu.core_type = #tpu.core_type<tc>, window_params = [{transform_indices = @transform_0, window_bounds = array<i64: 16, 32>}, {pipeline_mode = #tpu.pipeline_mode<synchronous>, transform_indices = @transform_1, window_bounds = array<i64: 416, 128>}, {pipeline_mode = #tpu.pipeline_mode<synchronous>, transform_indices = @transform_2, window_bounds = array<i64: 8, 128>}, {transform_indices = @transform_3, window_bounds = array<i64: 16, 1>}]} {
    %c0 = arith.constant 0 : index
    %c0_0 = arith.constant 0 : index
    %0 = vector.load %arg1[%c0, %c0_0] : memref<16x32xbf16, #tpu.memory_space<vmem>>, vector<16x32xbf16>
    %c0_1 = arith.constant 0 : index
    %c0_2 = arith.constant 0 : index
    %1 = vector.load %arg2[%c0_1, %c0_2] : memref<416x128xbf16, #tpu.memory_space<vmem>>, vector<32x128xbf16>
    %c32 = arith.constant 32 : index
    %c0_3 = arith.constant 0 : index
    %2 = vector.load %arg2[%c32, %c0_3] : memref<416x128xbf16, #tpu.memory_space<vmem>>, vector<128x128xbf16>
    %c160 = arith.constant 160 : index
    %c0_4 = arith.constant 0 : index
    %3 = vector.load %arg2[%c160, %c0_4] : memref<416x128xbf16, #tpu.memory_space<vmem>>, vector<128x128xbf16>
    %c288 = arith.constant 288 : index
    %c0_5 = arith.constant 0 : index
    %4 = vector.load %arg2[%c288, %c0_5] : memref<416x128xbf16, #tpu.memory_space<vmem>>, vector<128x128xbf16>
    %c0_6 = arith.constant 0 : index
    %c0_7 = arith.constant 0 : index
    %5 = vector.load %arg3[%c0_6, %c0_7] : memref<8x128xf32, #tpu.memory_space<vmem>>, vector<1x128xf32>
    %c1 = arith.constant 1 : index
    %c0_8 = arith.constant 0 : index
    %6 = vector.load %arg3[%c1, %c0_8] : memref<8x128xf32, #tpu.memory_space<vmem>>, vector<1x128xf32>
    %c2 = arith.constant 2 : index
    %c0_9 = arith.constant 0 : index
    %7 = vector.load %arg3[%c2, %c0_9] : memref<8x128xf32, #tpu.memory_space<vmem>>, vector<1x128xf32>
    %c3 = arith.constant 3 : index
    %c0_10 = arith.constant 0 : index
    %8 = vector.load %arg3[%c3, %c0_10] : memref<8x128xf32, #tpu.memory_space<vmem>>, vector<1x128xf32>
    %cst = arith.constant dense<0.000000e+00> : vector<16x128xf32>
    %9 = tpu.matmul %0, %1, %cst {dimension_numbers = #tpu.dot_dimension_numbers<[1], [0], [0], [1], [0, 0, 1, 1], [], []>} : vector<16x32xbf16>, vector<32x128xbf16>, vector<16x128xf32> -> vector<16x128xf32>
    %10 = vector.broadcast %5 : vector<1x128xf32> to vector<16x128xf32>
    %11 = arith.addf %9, %10 : vector<16x128xf32>
    %cst_11 = arith.constant 0.000000e+00 : f32
    %12 = vector.broadcast %cst_11 : f32 to vector<16x128xf32>
    %13 = arith.cmpf ogt, %11, %12 : vector<16x128xf32>
    %cst_12 = arith.constant 0.00999999977 : f32
    %14 = vector.broadcast %cst_12 : f32 to vector<16x128xf32>
    %15 = arith.mulf %14, %11 : vector<16x128xf32>
    %16 = arith.select %13, %11, %15 : vector<16x128xi1>, vector<16x128xf32>
    %17 = arith.truncf %16 : vector<16x128xf32> to vector<16x128xbf16>
    %cst_13 = arith.constant dense<0.000000e+00> : vector<16x128xf32>
    %18 = tpu.matmul %17, %2, %cst_13 {dimension_numbers = #tpu.dot_dimension_numbers<[1], [0], [0], [1], [0, 0, 1, 1], [], []>} : vector<16x128xbf16>, vector<128x128xbf16>, vector<16x128xf32> -> vector<16x128xf32>
    %19 = vector.broadcast %6 : vector<1x128xf32> to vector<16x128xf32>
    %20 = arith.addf %18, %19 : vector<16x128xf32>
    %cst_14 = arith.constant 0.000000e+00 : f32
    %21 = vector.broadcast %cst_14 : f32 to vector<16x128xf32>
    %22 = arith.cmpf ogt, %20, %21 : vector<16x128xf32>
    %cst_15 = arith.constant 0.00999999977 : f32
    %23 = vector.broadcast %cst_15 : f32 to vector<16x128xf32>
    %24 = arith.mulf %23, %20 : vector<16x128xf32>
    %25 = arith.select %22, %20, %24 : vector<16x128xi1>, vector<16x128xf32>
    %26 = arith.truncf %25 : vector<16x128xf32> to vector<16x128xbf16>
    %cst_16 = arith.constant dense<0.000000e+00> : vector<16x128xf32>
    %27 = tpu.matmul %26, %3, %cst_16 {dimension_numbers = #tpu.dot_dimension_numbers<[1], [0], [0], [1], [0, 0, 1, 1], [], []>} : vector<16x128xbf16>, vector<128x128xbf16>, vector<16x128xf32> -> vector<16x128xf32>
    %28 = vector.broadcast %7 : vector<1x128xf32> to vector<16x128xf32>
    %29 = arith.addf %27, %28 : vector<16x128xf32>
    %cst_17 = arith.constant 0.000000e+00 : f32
    %30 = vector.broadcast %cst_17 : f32 to vector<16x128xf32>
    %31 = arith.cmpf ogt, %29, %30 : vector<16x128xf32>
    %cst_18 = arith.constant 0.00999999977 : f32
    %32 = vector.broadcast %cst_18 : f32 to vector<16x128xf32>
    %33 = arith.mulf %32, %29 : vector<16x128xf32>
    %34 = arith.select %31, %29, %33 : vector<16x128xi1>, vector<16x128xf32>
    %35 = arith.truncf %34 : vector<16x128xf32> to vector<16x128xbf16>
    %cst_19 = arith.constant dense<0.000000e+00> : vector<16x128xf32>
    %36 = tpu.matmul %35, %4, %cst_19 {dimension_numbers = #tpu.dot_dimension_numbers<[1], [0], [0], [1], [0, 0, 1, 1], [], []>} : vector<16x128xbf16>, vector<128x128xbf16>, vector<16x128xf32> -> vector<16x128xf32>
    %37 = vector.broadcast %8 : vector<1x128xf32> to vector<16x128xf32>
    %38 = arith.addf %36, %37 : vector<16x128xf32>
    %39 = vector.extract_strided_slice %38 {offsets = [0, 0], sizes = [16, 1], strides = [1, 1]} : vector<16x128xf32> to vector<16x1xf32>
    %c0_20 = arith.constant 0 : index
    %c0_21 = arith.constant 0 : index
    %40 = vector.load %arg4[%c0_20, %c0_21] : memref<16x1xf32, #tpu.memory_space<vmem>>, vector<16x1xf32>
    tpu.vector_store %arg4[%c0_20, %c0_21], %39 {strides = array<i32>} : memref<16x1xf32, #tpu.memory_space<vmem>>, vector<16x1xf32>,
    return
  }
  func.func @transform_0(%arg0: i32) -> (i32, i32) {
    %c0_i32 = arith.constant 0 : i32
    %c0_i32_0 = arith.constant 0 : i32
    return %arg0, %c0_i32 : i32, i32
  }
  func.func @transform_1(%arg0: i32) -> (i32, i32) {
    %c0_i32 = arith.constant 0 : i32
    %c0_i32_0 = arith.constant 0 : i32
    %c0_i32_1 = arith.constant 0 : i32
    return %c0_i32, %c0_i32_0 : i32, i32
  }
  func.func @transform_2(%arg0: i32) -> (i32, i32) {
    %c0_i32 = arith.constant 0 : i32
    %c0_i32_0 = arith.constant 0 : i32
    %c0_i32_1 = arith.constant 0 : i32
    return %c0_i32, %c0_i32_0 : i32, i32
  }
  func.func @transform_3(%arg0: i32) -> (i32, i32) {
    %c0_i32 = arith.constant 0 : i32
    %c0_i32_0 = arith.constant 0 : i32
    return %arg0, %c0_i32 : i32, i32
  }
}

</mosaic_0001>

<bundles_post_ra>
// kernel: mlp_forward.1
= control target key start
LH: loop header
LB: loop body
LE: loop exit
PB: predicated region body
PF: predicated region fallthrough
CT: control target
= control target key end

     0   :  { %8 = vsyncpa [#allocation3], 0  ;;  %s943_s12 = smov 0   ;;  %s1052_s0 = inlined_call_operand.vmem [shape: bf16[32,32], index: 0, kind: input, shape index: {}]   ;;  %s1053_s1 = inlined_call_operand.hbm [shape: bf16[416,128], index: 1, kind: input, shape index: {}]   ;;  %s1054_s2 = inlined_call_operand.vmem [shape: f32[8,128], index: 2, kind: input, shape index: {}]   ;;  %s1055_s3 = inlined_call_operand.vmem [shape: f32[32,1], index: 3, kind: output, shape index: {}]  }
   0x1 LB: > { %s685_s13 = sadd.s32 4294967295, %s916_s12   ;;  %p687_p0 = scmp.ge.s32.totalorder %s916_s12, 1  ;;  %s916_s12 = sphi %s943_s12, %s14_s12  }
   0x2   : > { %p113_p1 = scmp.lt.s32.totalorder %s916_s12, 3  ;;  %s918_s14 = smov [#allocation2]  }
   0x3   : > { %s125_s15 = sshll.u32 %s918_s14, 4  ;;  %p957_p3 = scmp.eq.s32.totalorder %s685_s13, 0  ;;  %s126_s15 = int_to_ptr.vmem [resolvable:$true] %s125_s15 }
   0x4   : > { %p951_p2 = pnand %p687_p0, %p113_p1  ;;  %s878_s21 = scalar_lea.hbm %s1053_s1, 3328 }
   0x5   : > { %s1060_s17 = scalar_select %p957_p3, 1, 0 }
   0x6   : > { %s1059_s16 = scalar_select %p951_p2, 1, 0 }
   0x7   : > { %p832_p4 = pneg %p951_p2  ;;  %p879_p6 = scmp.ne.s32.totalorder %s1053_s1, %s878_s21 }
   0x8   : > { %p885_p10 = scmp.lt.u32.totalorder %s878_s21, %s1053_s1 }
   0x9   : > { %p965_p5 = pnand %p957_p3, %p832_p4 }
   0xb   : > { %p880_p7 = pneg %p965_p5 }
   0xd   : > { %p881_p8 = pnand %p880_p7, %p879_p6 }
   0xf   : > { %p882_p9 = pneg %p881_p8 }
  0x11   : > { %p887_p11 = pnand %p885_p10, %p882_p9 }
  0x13   : > { %890 = shalt.err (!%p887_p11)
}
  0x14   : > { %s891_s26 = scalar_lea.vmem %s126_s15, 3328  ;;  %p899_p1 = scmp.lt.s32.totalorder %s126_s15, %s126_s15 }
  0x15   : > { %p892_p12 = scmp.ne.s32.totalorder %s126_s15, %s891_s26  ;;  %p900_p4 = scmp.lt.s32.totalorder %s891_s26, %s891_s26 }
  0x17   : > { %p894_p13 = pnand %p892_p12, %p880_p7  ;;  %p901_p3 = por %p900_p4, %p899_p1 }
  0x19   : > { %p895_p0 = pneg %p894_p13 }
  0x1b   : > { %p902_p2 = pnand %p901_p3, %p895_p0 }
  0x1d   : > { %905 = shalt.err (!%p902_p2)
}
  0x1e   : > { %s919_s27 = smov 64   ;;  %s920_s28 = smov 4  }
  0x1f   : > { %835 = dma.hbm_to_vmem [thread:$0]  (!%p965_p5), %s1053_s1, 3328, %s126_s15, [#allocation3], %s919_s27, %s919_s27, %s920_s28  }
  0x20   : > { %p1062_p6 = scmp.ne.s32.totalorder %s1059_s16, 0 }
  0x21   : > { %p1063_p8 = scmp.ne.s32.totalorder (!%p1062_p6), %s1060_s17, 0 }
  0x22   : > { %153 = sbr.rel (%p1062_p6) target bundleno = 932 (0x3a4), region = 32 }
  0x29   : > { %911 = dma.done.wait (%p1063_p8), [#allocation3], 3328  }
  0x2a   : > { %913 = vsyncadd (%p1063_p8), [#allocation3], 4294963968  ;;  %s692_s4 = sshll.u32 %s685_s13, 1  ;;  %v921_v0 = vmov 0.0   ;;  %vm922_vm0 = vmmov 0   ;;  %v851_v1 = vld [vmem:[#allocation2] sm:$0xff]  }
  0x2b   : > { %760 = vmatprep.subr.bf16.mxu0 %v921_v0  ;;  %764 = vmatprep.mubr.msk.bf16.mxu0 %vm922_vm0, %v921_v0  ;;  %p178_p2 = scmp.lt.s32.totalorder %s692_s4, 3  ;;  %v852_v2 = vld [vmem:[#allocation2 + $0x8] sm:$0xff]   ;;  %v854_v3 = vld [vmem:[#allocation2 + $0x10] sm:$0xff]   ;;  %v855_v5 = vld [vmem:[#allocation2 + $0x18] sm:$0xff]   ;;  %vm269_vm1 = vcmask 261120   ;;  %vm614_vm8 = vcmask 7168  }
  0x2c   : > { %768 = vmatprep.subr.bf16.mxu1 %v921_v0  ;;  %784 = vmatprep.mubr.msk.bf16.mxu1 %vm922_vm0, %v921_v0  ;;  %v856_v6 = vld [vmem:[#allocation2 + $0x20] sm:$0xff]   ;;  %v857_v7 = vld [vmem:[#allocation2 + $0x28] sm:$0xff]   ;;  %v858_v8 = vld [vmem:[#allocation2 + $0x30] sm:$0xff]  }
  0x2d   : > { %s1065_s4 = smov (!%p178_p2, %s692_s4), 3  ;;  %761 = vmatpush3.bf16.msra.mxu0 %v851_v1  ;;  %769 = vmatpush3.bf16.msra.mxu1 %v854_v3  ;;  %v859_v9 = vld [vmem:[#allocation2 + $0x38] sm:$0xff]   ;;  %v860_v10 = vld [vmem:[#allocation2 + $0x40] sm:$0xff]   ;;  %v861_v11 = vld [vmem:[#allocation2 + $0x48] sm:$0xff]  }
  0x2e   : > { %s693_s5 = sshll.u32 %s1065_s4, 2  ;;  %762 = vmatprep.subr.bf16.mxu0 %v921_v0  ;;  %770 = vmatprep.subr.bf16.mxu1 %v921_v0  ;;  %v862_v12 = vld [vmem:[#allocation2 + $0x50] sm:$0xff]   ;;  %v863_v13 = vld [vmem:[#allocation2 + $0x58] sm:$0xff]   ;;  %v864_v14 = vld [vmem:[#allocation2 + $0x60] sm:$0xff]   ;;  %s695_s16 = sshll.u32 %s1065_s4, 3 }
  0x2f   : > { %s181_s8 = scalar_lea.vmem %s1052_s0, %s693_s5  ;;  %v865_v15 = vld [vmem:[#allocation2 + $0x68] sm:$0xff]   ;;  %v866_v16 = vld [vmem:[#allocation2 + $0x70] sm:$0xff]   ;;  %v867_v17 = vld [vmem:[#allocation2 + $0x78] sm:$0xff]   ;;  %s187_s21 = scalar_lea.vmem %s1055_s3, %s695_s16 }
  0x30   : > { %v853_v4 = vld [vmem:[%s181_s8] sm:$0xff]   ;;  %v869_v31 = vld [vmem:[#allocation2 + $0x88] sm:$0xff]   ;;  %v870_v32 = vld [vmem:[#allocation2 + $0x90] sm:$0xff]  }
  0x31   : > { %763 = vmatpush3.bf16.msra.mxu0 %v852_v2  ;;  %771 = vmatpush3.bf16.msra.mxu1 %v855_v5  ;;  %v696_v18 = vld [vmem:[%s1054_s2] ss:$0 sm:$0xff]  ;;  %v871_v33 = vld [vmem:[#allocation2 + $0x98] sm:$0xff]   ;;  %v873_v35 = vld [vmem:[#allocation2 + $0xa8] sm:$0xff]  }
  0x32   : > { %788 = vmatprep.subr.bf16.mxu0 %v921_v0  ;;  %772 = vmatprep.subr.bf16.mxu1 %v921_v0  ;;  %v868_v30 = vld [vmem:[#allocation2 + $0x80] sm:$0xff]   ;;  %v874_v36 = vld [vmem:[#allocation2 + $0xb0] sm:$0xff]   ;;  %v875_v37 = vld [vmem:[#allocation2 + $0xb8] sm:$0xff]  }
  0x33   : > { %v872_v34 = vld [vmem:[#allocation2 + $0xa0] sm:$0xff]   ;;  %v877_v51 = vld [vmem:[#allocation2 + $0xc8] sm:$0xff]  }
  0x34   : > { %765 = vmatmul.mubr.msk.bf16.vlgmr.msra.gmra.mrb[0].mxu0 %vm269_vm1, %v853_v4  ;;  %v701_v38 = vld [vmem:[%s1054_s2 + $0x1] ss:$0 sm:$0xff]  ;;  %v710_v52 = vld [vmem:[%s1054_s2 + $0x2] ss:$0 sm:$0xff] }
  0x35   : > { %804 = vmatprep.mubr.msk.bf16.mxu0 %vm922_vm0, %v921_v0  ;;  %773 = vmatpush3.bf16.msra.mxu1 %v856_v6  ;;  %v876_v50 = vld [vmem:[#allocation2 + $0xc0] sm:$0xff]  }
  0x36   : > { %774 = vmatprep.subr.bf16.mxu1 %v921_v0  ;;  %789 = vmatpush3.bf16.msra.mxu0 %v862_v12 }
  0x37   : > { %790 = vmatprep.subr.bf16.mxu0 %v921_v0 }
  0x39   : > { %775 = vmatpush3.bf16.msra.mxu1 %v857_v7 }
  0x3a   : > { %776 = vmatprep.subr.bf16.mxu1 %v921_v0  ;;  %791 = vmatpush3.bf16.msra.mxu0 %v863_v13 }
  0x3b   : > { %792 = vmatprep.subr.bf16.mxu0 %v921_v0 }
  0x3d   : > { %777 = vmatpush3.bf16.msra.mxu1 %v858_v8 }
  0x3e   : > { %778 = vmatprep.subr.bf16.mxu1 %v921_v0  ;;  %793 = vmatpush3.bf16.msra.mxu0 %v864_v14 }
  0x3f   : > { %794 = vmatprep.subr.bf16.mxu0 %v921_v0 }
  0x41   : > { %779 = vmatpush3.bf16.msra.mxu1 %v859_v9 }
  0x42   : > { %780 = vmatprep.subr.bf16.mxu1 %v921_v0  ;;  %795 = vmatpush3.bf16.msra.mxu0 %v865_v15 }
  0x43   : > { %796 = vmatprep.subr.bf16.mxu0 %v921_v0 }
  0x45   : > { %781 = vmatpush3.bf16.msra.mxu1 %v860_v10 }
  0x46   : > { %782 = vmatprep.subr.bf16.mxu1 %v921_v0  ;;  %797 = vmatpush3.bf16.msra.mxu0 %v866_v16 }
  0x47   : > { %798 = vmatprep.subr.bf16.mxu0 %v921_v0 }
  0x49   : > { %783 = vmatpush3.bf16.msra.mxu1 %v861_v11 }
  0x4a   : > { %808 = vmatprep.subr.bf16.mxu1 %v921_v0  ;;  %799 = vmatpush3.bf16.msra.mxu0 %v867_v17 }
  0x4b   : > { %800 = vmatprep.subr.bf16.mxu0 %v921_v0 }
  0x4e   : > { %801 = vmatpush3.bf16.msra.mxu0 %v868_v30 }
  0x4f   : > { %802 = vmatprep.subr.bf16.mxu0 %v921_v0 }
  0x52   : > { %803 = vmatpush3.bf16.msra.mxu0 %v869_v31 }
 0x107   : > { %v307_v19 = vpop.f32.mrb[0].mxu0 }
 0x108   : > { %v308_v20 = vadd.f32 %v696_v18, %v307_v19  ;;  %v766_v21 = vpop.f32.mrb[1].mxu0 }
 0x109   : > { %v310_v22 = vpop.f32.mrb[2].mxu0 }
 0x10a   : > { %v316_v23 = vmul.f32 0.01, %v308_v20  ;;  %v311_v24 = vadd.f32 %v696_v18, %v310_v22  ;;  %v767_v25 = vpop.f32.mrb[3].mxu0  ;;  %vm314_vm2 = vcmp.gt.f32.partialorder %v308_v20, 0.0 }
 0x10c   : > { %vm315_vm3 = vcmp.gt.f32.partialorder %v311_v24, 0.0  ;;  %v317_v26 = vmul.f32 0.01, %v311_v24  ;;  %v318_v27 = vsel %vm314_vm2, %v308_v20, %v316_v23 }
 0x10e   : > { %v319_v28 = vsel %vm315_vm3, %v311_v24, %v317_v26 }
 0x10f   : > { %v320_v29 = vpack.c.bf16 %v319_v28, %v318_v27 }
 0x111   : > { %785 = vmatmul.mubr.bf16.vlgmr.msra.gmra.mrb[0].mxu1 %v320_v29 }
 0x112   : > { %824 = vmatprep.mubr.msk.bf16.mxu1 %vm922_vm0, %v921_v0  ;;  %809 = vmatpush3.bf16.msra.mxu1 %v870_v32 }
 0x113   : > { %810 = vmatprep.subr.bf16.mxu1 %v921_v0 }
 0x116   : > { %811 = vmatpush3.bf16.msra.mxu1 %v871_v33 }
 0x117   : > { %812 = vmatprep.subr.bf16.mxu1 %v921_v0 }
 0x11a   : > { %813 = vmatpush3.bf16.msra.mxu1 %v872_v34 }
 0x11b   : > { %814 = vmatprep.subr.bf16.mxu1 %v921_v0 }
 0x11e   : > { %815 = vmatpush3.bf16.msra.mxu1 %v873_v35 }
 0x11f   : > { %816 = vmatprep.subr.bf16.mxu1 %v921_v0 }
 0x122   : > { %817 = vmatpush3.bf16.msra.mxu1 %v874_v36 }
 0x123   : > { %818 = vmatprep.subr.bf16.mxu1 %v921_v0 }
 0x126   : > { %819 = vmatpush3.bf16.msra.mxu1 %v875_v37 }
 0x127   : > { %820 = vmatprep.subr.bf16.mxu1 %v921_v0 }
 0x12a   : > { %821 = vmatpush3.bf16.msra.mxu1 %v876_v50 }
 0x12b   : > { %822 = vmatprep.subr.bf16.mxu1 %v921_v0  ;;  %v719_v0 = vld [vmem:[%s1054_s2 + $0x3] ss:$0 sm:$0xff] }
 0x12e   : > { %823 = vmatpush3.bf16.msra.mxu1 %v877_v51 }
 0x1e4   : > { %v407_v39 = vpop.f32.mrb[0].mxu1 }
 0x1e5   : > { %v408_v40 = vadd.f32 %v701_v38, %v407_v39  ;;  %v786_v41 = vpop.f32.mrb[1].mxu1 }
 0x1e6   : > { %v410_v42 = vpop.f32.mrb[2].mxu1 }
 0x1e7   : > { %v416_v43 = vmul.f32 0.01, %v408_v40  ;;  %v411_v44 = vadd.f32 %v701_v38, %v410_v42  ;;  %v787_v45 = vpop.f32.mrb[3].mxu1  ;;  %vm414_vm4 = vcmp.gt.f32.partialorder %v408_v40, 0.0 }
 0x1e9   : > { %vm415_vm5 = vcmp.gt.f32.partialorder %v411_v44, 0.0  ;;  %v417_v46 = vmul.f32 0.01, %v411_v44  ;;  %v418_v47 = vsel %vm414_vm4, %v408_v40, %v416_v43 }
 0x1eb   : > { %v419_v48 = vsel %vm415_vm5, %v411_v44, %v417_v46 }
 0x1ec   : > { %v420_v49 = vpack.c.bf16 %v419_v48, %v418_v47 }
 0x1ee   : > { %805 = vmatmul.mubr.bf16.vlgmr.msra.gmra.mrb[4].mxu0 %v420_v49 }
 0x2c1   : > { %v507_v53 = vpop.f32.mrb[4].mxu0 }
 0x2c2   : > { %v508_v54 = vadd.f32 %v710_v52, %v507_v53  ;;  %v806_v55 = vpop.f32.mrb[5].mxu0 }
 0x2c3   : > { %v510_v56 = vpop.f32.mrb[6].mxu0 }
 0x2c4   : > { %v516_v57 = vmul.f32 0.01, %v508_v54  ;;  %v511_v58 = vadd.f32 %v710_v52, %v510_v56  ;;  %v807_v59 = vpop.f32.mrb[7].mxu0  ;;  %vm514_vm6 = vcmp.gt.f32.partialorder %v508_v54, 0.0 }
 0x2c6   : > { %vm515_vm7 = vcmp.gt.f32.partialorder %v511_v58, 0.0  ;;  %v517_v60 = vmul.f32 0.01, %v511_v58  ;;  %v518_v61 = vsel %vm514_vm6, %v508_v54, %v516_v57 }
 0x2c8   : > { %v519_v62 = vsel %vm515_vm7, %v511_v58, %v517_v60 }
 0x2c9   : > { %v520_v63 = vpack.c.bf16 %v519_v62, %v518_v61 }
 0x2cb   : > { %825 = vmatmul.mubr.bf16.vlgmr.msra.gmra.mrb[4].mxu1 %v520_v63 }
 0x39e   : > { %v607_v1 = vpop.f32.mrb[4].mxu1 }
 0x39f   : > { %v608_v2 = vadd.f32 %v719_v0, %v607_v1  ;;  %v826_v3 = vpop.f32.mrb[5].mxu1 }
 0x3a0   : > { %v610_v4 = vpop.f32.mrb[6].mxu1 }
 0x3a1   : > { %615 = vst.msk [vmem:[%s187_s21] sm:$0xff] %vm614_vm8, %v608_v2  ;;  %v611_v5 = vadd.f32 %v719_v0, %v610_v4  ;;  %v827_v6 = vpop.f32.mrb[7].mxu1 }
 0x3a3   : > { %616 = vst.msk [vmem:[%s187_s21 + $0x8] sm:$0xff] %vm614_vm8, %v611_v5 }
 0x3a4 PF: > { %s14_s12 = sadd.s32 1, %s916_s12  }
 0x3a5   : > { %p11_p3 = scmp.ge.s32.totalorder %s14_s12, 4  }
 0x3a7   :  { %13 = sbr.rel (!%p11_p3) target bundleno = 1 (0x1), region = 67 }
 0x3ae   :  { %639 = vsyncpa [#allocation3], 1 }
 0x3af   :  { %641 = vsyncpa [#allocation3 + $0x1], 1 }

</bundles_post_ra>
